<compile_context>
chip_gen: v6e
topology: v6e:2x2x1
jax: 0.10.0
libtpu: 0.0.40
codegen_flags: <defaults>
</compile_context>

<pallas_src>
from functools import partial

import jax
import jax.numpy as jnp
from jax import lax
from jax.experimental import pallas as pl
from jax.experimental.pallas import tpu as pltpu


# ----------------------------------------------------------------- kernels --
def _conv_bn_relu_kernel(z_ref, w_ref, b_ref, o_ref, *, n_rows, w_out):
    """One batch element: out = relu(sum_s z[s*Wo : s*Wo+M] @ W[s] + shift).

    z_ref : (1, M + (S-1)*Wo, K) bf16   space-to-depth conv input rows
    w_ref : (S, K, Cout)         bf16   BN scale already folded in, S in {1,2}
    b_ref : (1, Cout)            f32    BN shift
    o_ref : (1, M, Cout)         bf16   with M = Ho*Wo
    """
    acc = jnp.dot(z_ref[0, pl.ds(0, n_rows), :], w_ref[0],
                  preferred_element_type=jnp.float32)
    for s in range(1, w_ref.shape[0]):                      # static unroll (<=2)
        acc = acc + jnp.dot(z_ref[0, pl.ds(s * w_out, n_rows), :], w_ref[s],
                            preferred_element_type=jnp.float32)
    acc = acc + b_ref[...]
    o_ref[0] = jnp.maximum(acc, 0.0).astype(o_ref.dtype)


def _conv_bn_relu_proj_kernel(z_ref, w_ref, b_ref, pw_ref, pb_ref, o_ref, *,
                              n_rows, w_out):
    """Last conv layer (conv+BN+ReLU) fused with the final 1x1 projection + bias."""
    acc = jnp.dot(z_ref[0, pl.ds(0, n_rows), :], w_ref[0],
                  preferred_element_type=jnp.float32)
    for s in range(1, w_ref.shape[0]):
        acc = acc + jnp.dot(z_ref[0, pl.ds(s * w_out, n_rows), :], w_ref[s],
                            preferred_element_type=jnp.float32)
    acc = acc + b_ref[...]
    h = jnp.maximum(acc, 0.0).astype(pw_ref.dtype)           # bf16 for the MXU
    out = jnp.dot(h, pw_ref[...], preferred_element_type=jnp.float32)
    o_ref[0] = (out + pb_ref[...]).astype(o_ref.dtype)


def _vmem_limit(block_bytes):
    # double-buffered blocks + in-kernel f32 temporaries + slack, capped for v7x
    return min(4 * int(block_bytes) + (16 << 20), 56 << 20)


# ----------------------------------------------------------- pallas wrappers --
def conv_bn_relu(z, w, shift, *, n_rows, w_out, out_dtype=jnp.bfloat16):
    """z: (B, zr, K) bf16, w: (S, K, Cout) bf16, shift: (1, Cout) f32."""
    B, zr, K = z.shape
    n_shifts, _, cout = w.shape
    out_isz = jnp.dtype(out_dtype).itemsize
    blk_bytes = (zr * K * z.dtype.itemsize + n_shifts * K * cout * w.dtype.itemsize
                 + n_rows * cout * out_isz + n_rows * cout * 4)
    cost = pl.CostEstimate(
        flops=2 * B * n_rows * n_shifts * K * cout,
        transcendentals=0,
        bytes_accessed=(z.size * z.dtype.itemsize + w.size * w.dtype.itemsize
                        + shift.size * 4 + B * n_rows * cout * out_isz))
    kernel = partial(_conv_bn_relu_kernel, n_rows=n_rows, w_out=w_out)
    return pl.pallas_call(
        kernel,
        out_shape=jax.ShapeDtypeStruct((B, n_rows, cout), out_dtype),
        grid_spec=pltpu.PrefetchScalarGridSpec(
            num_scalar_prefetch=0,
            grid=(B,),
            in_specs=[
                pl.BlockSpec((1, zr, K), lambda b: (b, 0, 0)),
                pl.BlockSpec((n_shifts, K, cout), lambda b: (0, 0, 0)),
                pl.BlockSpec((1, cout), lambda b: (0, 0)),
            ],
            out_specs=pl.BlockSpec((1, n_rows, cout), lambda b: (b, 0, 0)),
        ),
        compiler_params=pltpu.CompilerParams(
            dimension_semantics=("parallel",),
            vmem_limit_bytes=_vmem_limit(blk_bytes)),
        cost_estimate=cost,
    )(z, w, shift)


def conv_bn_relu_proj(z, w, shift, pw, pb, *, n_rows, w_out,
                      out_dtype=jnp.float32):
    """Fused conv4 + BN + ReLU + 1x1 projection (+bias)."""
    B, zr, K = z.shape
    n_shifts, _, cout = w.shape
    emb = pw.shape[-1]
    out_isz = jnp.dtype(out_dtype).itemsize
    blk_bytes = (zr * K * z.dtype.itemsize + n_shifts * K * cout * w.dtype.itemsize
                 + cout * emb * pw.dtype.itemsize + n_rows * emb * out_isz
                 + n_rows * (cout + emb) * 4)
    cost = pl.CostEstimate(
        flops=B * n_rows * (2 * n_shifts * K * cout + 2 * cout * emb),
        transcendentals=0,
        bytes_accessed=(z.size * z.dtype.itemsize + w.size * w.dtype.itemsize
                        + pw.size * pw.dtype.itemsize + (shift.size + pb.size) * 4
                        + B * n_rows * emb * out_isz))
    kernel = partial(_conv_bn_relu_proj_kernel, n_rows=n_rows, w_out=w_out)
    return pl.pallas_call(
        kernel,
        out_shape=jax.ShapeDtypeStruct((B, n_rows, emb), out_dtype),
        grid_spec=pltpu.PrefetchScalarGridSpec(
            num_scalar_prefetch=0,
            grid=(B,),
            in_specs=[
                pl.BlockSpec((1, zr, K), lambda b: (b, 0, 0)),
                pl.BlockSpec((n_shifts, K, cout), lambda b: (0, 0, 0)),
                pl.BlockSpec((1, cout), lambda b: (0, 0)),
                pl.BlockSpec((cout, emb), lambda b: (0, 0)),
                pl.BlockSpec((1, emb), lambda b: (0, 0)),
            ],
            out_specs=pl.BlockSpec((1, n_rows, emb), lambda b: (b, 0, 0)),
        ),
        compiler_params=pltpu.CompilerParams(
            dimension_semantics=("parallel",),
            vmem_limit_bytes=_vmem_limit(blk_bytes)),
        cost_estimate=cost,
    )(z, w, shift, pw, pb)


# -------------------------------------------------------------------- glue --
def _space_to_depth_rows(x):
    """x: (B, H, W, C) NHWC, H and W even.

    Returns z of shape (B, (Ho+1)*Wo, 8*C) with Ho=H//2, Wo=W//2, such that the
    stride-2 3x3 'same' conv becomes, for output pixel q = ho*Wo + wo,
        out[q] = z[q] @ W2[0] + z[q + Wo] @ W2[1]
    with W2 from _pack_conv_weight.  z channel layout:
        j = dw*4C + (ph*2 + pw)*C + c   <->   x_pad[2*(ho+dh)+ph, 2*(wo+dw)+pw, c]
    """
    B, H, W, C = x.shape
    assert H % 2 == 0 and W % 2 == 0, "ConvStem needs even H/W at every stage"
    xp = jnp.pad(x, ((0, 0), (1, 1), (1, 1), (0, 0)))
    hs, ws = (H + 2) // 2, (W + 2) // 2                    # Ho+1, Wo+1
    y = xp.reshape(B, hs, 2, ws, 2, C).transpose(0, 1, 3, 2, 4, 5)
    y = y.reshape(B, hs, ws, 4 * C)                        # chan = (ph*2+pw)*C + c
    wo = ws - 1
    z = jnp.concatenate([y[:, :, :wo, :], y[:, :, 1:, :]], axis=-1)
    return z.reshape(B, hs * wo, 8 * C), H // 2, W // 2


def _prep_layer_inputs(h, w2):
    """Build (z, w, ho, wo) for one conv layer.

    For narrow layers (16*Cin <= 128) the dh rows are duplicated into the
    channel axis so the kernel runs ONE matmul with K = 16*Cin (half the MXU
    passes vs. two K = 8*Cin matmuls, negligible extra HBM since Cin is tiny).
    Wide layers keep the compact two-matmul form.
    """
    z, ho, wo = _space_to_depth_rows(h)
    B, _, k8 = z.shape
    cout = w2.shape[-1]
    if 2 * k8 <= 128:                                      # 16*Cin <= 128
        zz = z.reshape(B, ho + 1, wo, k8)
        z = jnp.concatenate([zz[:, :ho], zz[:, 1:]], axis=-1)
        z = z.reshape(B, ho * wo, 2 * k8)
        w = w2.reshape(1, 2 * k8, cout)                    # dh folded into K
    else:
        w = w2
    return z, w, ho, wo


def _pack_conv_weight(w_oihw, scale):
    """(Cout, Cin, 3, 3) OIHW conv weight -> (2, 8*Cin, Cout) matching the
    _space_to_depth_rows channel layout, with the BN scale folded in."""
    cout, cin, _, _ = w_oihw.shape
    w4 = jnp.zeros((cout, cin, 4, 4), w_oihw.dtype).at[:, :, :3, :3].set(w_oihw)
    w4 = w4.reshape(cout, cin, 2, 2, 2, 2)                 # (co, c, dh, ph, dw, pw)
    w2 = w4.transpose(2, 4, 3, 5, 1, 0).reshape(2, 8 * cin, cout)
    return w2 * scale[None, None, :]


def init_convstem_params(key, embed_dim=32, in_chans=3):
    assert embed_dim % 8 == 0
    params = {"convs": [], "bns": []}
    input_dim, output_dim = in_chans, embed_dim // 8
    for _ in range(4):
        key, k = jax.random.split(key)
        params["convs"].append(
            0.1 * jax.random.normal(k, (output_dim, input_dim, 3, 3), jnp.float32))
        params["bns"].append({
            "gamma": jnp.ones((output_dim,), jnp.float32),
            "beta": jnp.zeros((output_dim,), jnp.float32),
            "mean": jnp.zeros((output_dim,), jnp.float32),
            "var": jnp.ones((output_dim,), jnp.float32),
        })
        input_dim, output_dim = output_dim, output_dim * 2
    key, k1, k2 = jax.random.split(key, 3)
    params["proj_w"] = 0.1 * jax.random.normal(k1, (embed_dim, input_dim, 1, 1), jnp.float32)
    params["proj_b"] = 0.01 * jax.random.normal(k2, (embed_dim,), jnp.float32)
    return params


def conv_stem_forward(x, params, embed_dim):
    """x: (B, 3, H, W) NCHW (PyTorch convention) -> (B, (H//16)*(W//16), embed_dim)."""
    eps = 1e-5
    B = x.shape[0]
    h = jnp.transpose(x, (0, 2, 3, 1)).astype(jnp.bfloat16)   # NHWC, bf16 once

    folded = []
    for l in range(4):
        w, bn = params["convs"][l], params["bns"][l]
        scale = bn["gamma"] * lax.rsqrt(bn["var"] + eps)
        shift = (bn["beta"] - bn["mean"] * scale).astype(jnp.float32).reshape(1, -1)
        folded.append((_pack_conv_weight(w, scale).astype(jnp.bfloat16), shift))

    # conv1..conv3: fused conv + BN + ReLU, bf16 activations, NHWC
    for l in range(3):
        w2, shift = folded[l]
        z, w, ho, wo = _prep_layer_inputs(h, w2)
        out = conv_bn_relu(z, w, shift, n_rows=ho * wo, w_out=wo)
        h = out.reshape(B, ho, wo, w2.shape[-1])

    # conv4 + BN + ReLU fused with the final 1x1 projection (+bias)
    w2, shift = folded[3]
    z, w, ho, wo = _prep_layer_inputs(h, w2)
    pw = params["proj_w"].reshape(embed_dim, -1).T.astype(jnp.bfloat16)
    pb = params["proj_b"].astype(jnp.float32).reshape(1, -1)
    out = conv_bn_relu_proj(z, w, shift, pw, pb, n_rows=ho * wo, w_out=wo)
    return out                                             # norm = Identity


# ------------------------------------------------------------ pure-JAX ref --
def conv_stem_reference(x, params, embed_dim):
    """Reference mirroring the kernel's bf16 quantization points (tight check)."""
    eps = 1e-5
    bf = lambda a: a.astype(jnp.bfloat16).astype(jnp.float32)
    y = bf(x)
    for l in range(4):
        w, bn = params["convs"][l], params["bns"][l]
        scale = bn["gamma"] / jnp.sqrt(bn["var"] + eps)
        shift = bn["beta"] - bn["mean"] * scale
        wf = bf(w * scale[:, None, None, None])            # BN scale folded, bf16
        y = lax.conv_general_dilated(
            y, wf, (2, 2), ((1, 1), (1, 1)),
            dimension_numbers=("NCHW", "OIHW", "NCHW"),
            precision=lax.Precision.HIGHEST)
        y = bf(jnp.maximum(y + shift.reshape(1, -1, 1, 1), 0.0))
    y = lax.conv_general_dilated(
        y, bf(params["proj_w"]), (1, 1), ((0, 0), (0, 0)),
        dimension_numbers=("NCHW", "OIHW", "NCHW"),
        precision=lax.Precision.HIGHEST)
    y = y + params["proj_b"].reshape(1, -1, 1, 1)
    B, C, H, W = y.shape
    return y.reshape(B, C, H * W).transpose(0, 2, 1)


# -------------------------------------------------------------------- main --
if __name__ == "__main__":
    EMBED_DIM = 32      # divisible by 8 (channels: 3 -> 4 -> 8 -> 16 -> 32 -> 32)
    IMG = 32            # 4 stride-2 convs -> 16x downsample -> 2x2 = 4 patches
    B = 2

    key = jax.random.PRNGKey(0)
    key, kx = jax.random.split(key)
    x = jax.random.normal(kx, (B, 3, IMG, IMG), jnp.float32)
    params = init_convstem_params(key, embed_dim=EMBED_DIM, in_chans=3)

    fwd = jax.jit(partial(conv_stem_forward, embed_dim=EMBED_DIM))
    out = jax.block_until_ready(fwd(x, params))
    ref = jax.block_until_ready(conv_stem_reference(x, params, EMBED_DIM))

    assert out.shape == (B, (IMG // 16) * (IMG // 16), EMBED_DIM), out.shape
    max_err = float(jnp.max(jnp.abs(out - ref)))
    assert jnp.allclose(out, ref, rtol=2e-2, atol=2e-2), max_err

    print("KERNEL_OK")
</pallas_src>

<mosaic_0001>
module attributes {stable_mosaic.version = 11 : i64} {
  func.func @_conv_bn_relu_kernel(%arg0: i32, %arg1: memref<1x256x48xbf16, #tpu.memory_space<vmem>>, %arg2: memref<1x48x4xbf16, #tpu.memory_space<vmem>>, %arg3: memref<1x4xf32, #tpu.memory_space<vmem>>, %arg4: memref<1x256x4xbf16, #tpu.memory_space<vmem>>) attributes {dimension_semantics = [#tpu.dimension_semantics<parallel>], iteration_bounds = array<i64: 2>, scalar_prefetch = 0 : i64, scratch_operands = 0 : i64, tpu.core_type = #tpu.core_type<tc>, window_params = [{transform_indices = @transform_0, window_bounds = array<i64: 1, 256, 48>}, {pipeline_mode = #tpu.pipeline_mode<synchronous>, transform_indices = @transform_1, window_bounds = array<i64: 1, 48, 4>}, {pipeline_mode = #tpu.pipeline_mode<synchronous>, transform_indices = @transform_2, window_bounds = array<i64: 1, 4>}, {transform_indices = @transform_3, window_bounds = array<i64: 1, 256, 4>}]} {
    %c0 = arith.constant 0 : index
    %c0_0 = arith.constant 0 : index
    %c0_1 = arith.constant 0 : index
    %0 = vector.load %arg1[%c0, %c0_0, %c0_1] : memref<1x256x48xbf16, #tpu.memory_space<vmem>>, vector<1x256x48xbf16>
    %1 = vector.shape_cast %0 : vector<1x256x48xbf16> to vector<256x48xbf16>
    %c0_2 = arith.constant 0 : index
    %c0_3 = arith.constant 0 : index
    %c0_4 = arith.constant 0 : index
    %2 = vector.load %arg2[%c0_2, %c0_3, %c0_4] : memref<1x48x4xbf16, #tpu.memory_space<vmem>>, vector<1x48x4xbf16>
    %3 = vector.shape_cast %2 : vector<1x48x4xbf16> to vector<48x4xbf16>
    %cst = arith.constant dense<0.000000e+00> : vector<256x4xf32>
    %4 = tpu.matmul %1, %3, %cst {dimension_numbers = #tpu.dot_dimension_numbers<[1], [0], [0], [1], [0, 0, 1, 1], [], []>} : vector<256x48xbf16>, vector<48x4xbf16>, vector<256x4xf32> -> vector<256x4xf32>
    %c0_5 = arith.constant 0 : index
    %c0_6 = arith.constant 0 : index
    %5 = vector.load %arg3[%c0_5, %c0_6] : memref<1x4xf32, #tpu.memory_space<vmem>>, vector<1x4xf32>
    %6 = vector.broadcast %5 : vector<1x4xf32> to vector<256x4xf32>
    %7 = arith.addf %4, %6 : vector<256x4xf32>
    %cst_7 = arith.constant 0.000000e+00 : f32
    %8 = vector.broadcast %cst_7 : f32 to vector<256x4xf32>
    %9 = arith.maximumf %7, %8 : vector<256x4xf32>
    %10 = arith.truncf %9 : vector<256x4xf32> to vector<256x4xbf16>
    %c0_8 = arith.constant 0 : index
    %c0_9 = arith.constant 0 : index
    %c0_10 = arith.constant 0 : index
    %11 = vector.load %arg4[%c0_8, %c0_9, %c0_10] : memref<1x256x4xbf16, #tpu.memory_space<vmem>>, vector<1x256x4xbf16>
    %12 = vector.shape_cast %11 : vector<1x256x4xbf16> to vector<256x4xbf16>
    %13 = vector.shape_cast %10 : vector<256x4xbf16> to vector<1x256x4xbf16>
    tpu.vector_store %arg4[%c0_8, %c0_9, %c0_10], %13 {strides = array<i32>} : memref<1x256x4xbf16, #tpu.memory_space<vmem>>, vector<1x256x4xbf16>,
    return
  }
  func.func @transform_0(%arg0: i32) -> (i32, i32, i32) {
    %c0_i32 = arith.constant 0 : i32
    %c0_i32_0 = arith.constant 0 : i32
    %c0_i32_1 = arith.constant 0 : i32
    return %arg0, %c0_i32, %c0_i32_0 : i32, i32, i32
  }
  func.func @transform_1(%arg0: i32) -> (i32, i32, i32) {
    %c0_i32 = arith.constant 0 : i32
    %c0_i32_0 = arith.constant 0 : i32
    %c0_i32_1 = arith.constant 0 : i32
    %c0_i32_2 = arith.constant 0 : i32
    return %c0_i32, %c0_i32_0, %c0_i32_1 : i32, i32, i32
  }
  func.func @transform_2(%arg0: i32) -> (i32, i32) {
    %c0_i32 = arith.constant 0 : i32
    %c0_i32_0 = arith.constant 0 : i32
    %c0_i32_1 = arith.constant 0 : i32
    return %c0_i32, %c0_i32_0 : i32, i32
  }
  func.func @transform_3(%arg0: i32) -> (i32, i32, i32) {
    %c0_i32 = arith.constant 0 : i32
    %c0_i32_0 = arith.constant 0 : i32
    %c0_i32_1 = arith.constant 0 : i32
    return %arg0, %c0_i32, %c0_i32_0 : i32, i32, i32
  }
}

module attributes {stable_mosaic.version = 11 : i64} {
  func.func @_conv_bn_relu_kernel(%arg0: i32, %arg1: memref<1x64x64xbf16, #tpu.memory_space<vmem>>, %arg2: memref<1x64x8xbf16, #tpu.memory_space<vmem>>, %arg3: memref<1x8xf32, #tpu.memory_space<vmem>>, %arg4: memref<1x64x8xbf16, #tpu.memory_space<vmem>>) attributes {dimension_semantics = [#tpu.dimension_semantics<parallel>], iteration_bounds = array<i64: 2>, scalar_prefetch = 0 : i64, scratch_operands = 0 : i64, tpu.core_type = #tpu.core_type<tc>, window_params = [{transform_indices = @transform_0, window_bounds = array<i64: 1, 64, 64>}, {pipeline_mode = #tpu.pipeline_mode<synchronous>, transform_indices = @transform_1, window_bounds = array<i64: 1, 64, 8>}, {pipeline_mode = #tpu.pipeline_mode<synchronous>, transform_indices = @transform_2, window_bounds = array<i64: 1, 8>}, {transform_indices = @transform_3, window_bounds = array<i64: 1, 64, 8>}]} {
    %c0 = arith.constant 0 : index
    %c0_0 = arith.constant 0 : index
    %c0_1 = arith.constant 0 : index
    %0 = vector.load %arg1[%c0, %c0_0, %c0_1] : memref<1x64x64xbf16, #tpu.memory_space<vmem>>, vector<1x64x64xbf16>
    %1 = vector.shape_cast %0 : vector<1x64x64xbf16> to vector<64x64xbf16>
    %c0_2 = arith.constant 0 : index
    %c0_3 = arith.constant 0 : index
    %c0_4 = arith.constant 0 : index
    %2 = vector.load %arg2[%c0_2, %c0_3, %c0_4] : memref<1x64x8xbf16, #tpu.memory_space<vmem>>, vector<1x64x8xbf16>
    %3 = vector.shape_cast %2 : vector<1x64x8xbf16> to vector<64x8xbf16>
    %cst = arith.constant dense<0.000000e+00> : vector<64x8xf32>
    %4 = tpu.matmul %1, %3, %cst {dimension_numbers = #tpu.dot_dimension_numbers<[1], [0], [0], [1], [0, 0, 1, 1], [], []>} : vector<64x64xbf16>, vector<64x8xbf16>, vector<64x8xf32> -> vector<64x8xf32>
    %c0_5 = arith.constant 0 : index
    %c0_6 = arith.constant 0 : index
    %5 = vector.load %arg3[%c0_5, %c0_6] : memref<1x8xf32, #tpu.memory_space<vmem>>, vector<1x8xf32>
    %6 = vector.broadcast %5 : vector<1x8xf32> to vector<64x8xf32>
    %7 = arith.addf %4, %6 : vector<64x8xf32>
    %cst_7 = arith.constant 0.000000e+00 : f32
    %8 = vector.broadcast %cst_7 : f32 to vector<64x8xf32>
    %9 = arith.maximumf %7, %8 : vector<64x8xf32>
    %10 = arith.truncf %9 : vector<64x8xf32> to vector<64x8xbf16>
    %c0_8 = arith.constant 0 : index
    %c0_9 = arith.constant 0 : index
    %c0_10 = arith.constant 0 : index
    %11 = vector.load %arg4[%c0_8, %c0_9, %c0_10] : memref<1x64x8xbf16, #tpu.memory_space<vmem>>, vector<1x64x8xbf16>
    %12 = vector.shape_cast %11 : vector<1x64x8xbf16> to vector<64x8xbf16>
    %13 = vector.shape_cast %10 : vector<64x8xbf16> to vector<1x64x8xbf16>
    tpu.vector_store %arg4[%c0_8, %c0_9, %c0_10], %13 {strides = array<i32>} : memref<1x64x8xbf16, #tpu.memory_space<vmem>>, vector<1x64x8xbf16>,
    return
  }
  func.func @transform_0(%arg0: i32) -> (i32, i32, i32) {
    %c0_i32 = arith.constant 0 : i32
    %c0_i32_0 = arith.constant 0 : i32
    %c0_i32_1 = arith.constant 0 : i32
    return %arg0, %c0_i32, %c0_i32_0 : i32, i32, i32
  }
  func.func @transform_1(%arg0: i32) -> (i32, i32, i32) {
    %c0_i32 = arith.constant 0 : i32
    %c0_i32_0 = arith.constant 0 : i32
    %c0_i32_1 = arith.constant 0 : i32
    %c0_i32_2 = arith.constant 0 : i32
    return %c0_i32, %c0_i32_0, %c0_i32_1 : i32, i32, i32
  }
  func.func @transform_2(%arg0: i32) -> (i32, i32) {
    %c0_i32 = arith.constant 0 : i32
    %c0_i32_0 = arith.constant 0 : i32
    %c0_i32_1 = arith.constant 0 : i32
    return %c0_i32, %c0_i32_0 : i32, i32
  }
  func.func @transform_3(%arg0: i32) -> (i32, i32, i32) {
    %c0_i32 = arith.constant 0 : i32
    %c0_i32_0 = arith.constant 0 : i32
    %c0_i32_1 = arith.constant 0 : i32
    return %arg0, %c0_i32, %c0_i32_0 : i32, i32, i32
  }
}

module attributes {stable_mosaic.version = 11 : i64} {
  func.func @_conv_bn_relu_kernel(%arg0: i32, %arg1: memref<1x16x128xbf16, #tpu.memory_space<vmem>>, %arg2: memref<1x128x16xbf16, #tpu.memory_space<vmem>>, %arg3: memref<1x16xf32, #tpu.memory_space<vmem>>, %arg4: memref<1x16x16xbf16, #tpu.memory_space<vmem>>) attributes {dimension_semantics = [#tpu.dimension_semantics<parallel>], iteration_bounds = array<i64: 2>, scalar_prefetch = 0 : i64, scratch_operands = 0 : i64, tpu.core_type = #tpu.core_type<tc>, window_params = [{transform_indices = @transform_0, window_bounds = array<i64: 1, 16, 128>}, {pipeline_mode = #tpu.pipeline_mode<synchronous>, transform_indices = @transform_1, window_bounds = array<i64: 1, 128, 16>}, {pipeline_mode = #tpu.pipeline_mode<synchronous>, transform_indices = @transform_2, window_bounds = array<i64: 1, 16>}, {transform_indices = @transform_3, window_bounds = array<i64: 1, 16, 16>}]} {
    %c0 = arith.constant 0 : index
    %c0_0 = arith.constant 0 : index
    %c0_1 = arith.constant 0 : index
    %0 = vector.load %arg1[%c0, %c0_0, %c0_1] : memref<1x16x128xbf16, #tpu.memory_space<vmem>>, vector<1x16x128xbf16>
    %1 = vector.shape_cast %0 : vector<1x16x128xbf16> to vector<16x128xbf16>
    %c0_2 = arith.constant 0 : index
    %c0_3 = arith.constant 0 : index
    %c0_4 = arith.constant 0 : index
    %2 = vector.load %arg2[%c0_2, %c0_3, %c0_4] : memref<1x128x16xbf16, #tpu.memory_space<vmem>>, vector<1x128x16xbf16>
    %3 = vector.shape_cast %2 : vector<1x128x16xbf16> to vector<128x16xbf16>
    %cst = arith.constant dense<0.000000e+00> : vector<16x16xf32>
    %4 = tpu.matmul %1, %3, %cst {dimension_numbers = #tpu.dot_dimension_numbers<[1], [0], [0], [1], [0, 0, 1, 1], [], []>} : vector<16x128xbf16>, vector<128x16xbf16>, vector<16x16xf32> -> vector<16x16xf32>
    %c0_5 = arith.constant 0 : index
    %c0_6 = arith.constant 0 : index
    %5 = vector.load %arg3[%c0_5, %c0_6] : memref<1x16xf32, #tpu.memory_space<vmem>>, vector<1x16xf32>
    %6 = vector.broadcast %5 : vector<1x16xf32> to vector<16x16xf32>
    %7 = arith.addf %4, %6 : vector<16x16xf32>
    %cst_7 = arith.constant 0.000000e+00 : f32
    %8 = vector.broadcast %cst_7 : f32 to vector<16x16xf32>
    %9 = arith.maximumf %7, %8 : vector<16x16xf32>
    %10 = arith.truncf %9 : vector<16x16xf32> to vector<16x16xbf16>
    %c0_8 = arith.constant 0 : index
    %c0_9 = arith.constant 0 : index
    %c0_10 = arith.constant 0 : index
    %11 = vector.load %arg4[%c0_8, %c0_9, %c0_10] : memref<1x16x16xbf16, #tpu.memory_space<vmem>>, vector<1x16x16xbf16>
    %12 = vector.shape_cast %11 : vector<1x16x16xbf16> to vector<16x16xbf16>
    %13 = vector.shape_cast %10 : vector<16x16xbf16> to vector<1x16x16xbf16>
    tpu.vector_store %arg4[%c0_8, %c0_9, %c0_10], %13 {strides = array<i32>} : memref<1x16x16xbf16, #tpu.memory_space<vmem>>, vector<1x16x16xbf16>,
    return
  }
  func.func @transform_0(%arg0: i32) -> (i32, i32, i32) {
    %c0_i32 = arith.constant 0 : i32
    %c0_i32_0 = arith.constant 0 : i32
    %c0_i32_1 = arith.constant 0 : i32
    return %arg0, %c0_i32, %c0_i32_0 : i32, i32, i32
  }
  func.func @transform_1(%arg0: i32) -> (i32, i32, i32) {
    %c0_i32 = arith.constant 0 : i32
    %c0_i32_0 = arith.constant 0 : i32
    %c0_i32_1 = arith.constant 0 : i32
    %c0_i32_2 = arith.constant 0 : i32
    return %c0_i32, %c0_i32_0, %c0_i32_1 : i32, i32, i32
  }
  func.func @transform_2(%arg0: i32) -> (i32, i32) {
    %c0_i32 = arith.constant 0 : i32
    %c0_i32_0 = arith.constant 0 : i32
    %c0_i32_1 = arith.constant 0 : i32
    return %c0_i32, %c0_i32_0 : i32, i32
  }
  func.func @transform_3(%arg0: i32) -> (i32, i32, i32) {
    %c0_i32 = arith.constant 0 : i32
    %c0_i32_0 = arith.constant 0 : i32
    %c0_i32_1 = arith.constant 0 : i32
    return %arg0, %c0_i32, %c0_i32_0 : i32, i32, i32
  }
}

module attributes {stable_mosaic.version = 11 : i64} {
  func.func @_conv_bn_relu_proj_kernel(%arg0: i32, %arg1: memref<1x6x128xbf16, #tpu.memory_space<vmem>>, %arg2: memref<2x128x32xbf16, #tpu.memory_space<vmem>>, %arg3: memref<1x32xf32, #tpu.memory_space<vmem>>, %arg4: memref<32x32xbf16, #tpu.memory_space<vmem>>, %arg5: memref<1x32xf32, #tpu.memory_space<vmem>>, %arg6: memref<1x4x32xf32, #tpu.memory_space<vmem>>) attributes {dimension_semantics = [#tpu.dimension_semantics<parallel>], iteration_bounds = array<i64: 2>, scalar_prefetch = 0 : i64, scratch_operands = 0 : i64, tpu.core_type = #tpu.core_type<tc>, window_params = [{transform_indices = @transform_0, window_bounds = array<i64: 1, 6, 128>}, {pipeline_mode = #tpu.pipeline_mode<synchronous>, transform_indices = @transform_1, window_bounds = array<i64: 2, 128, 32>}, {pipeline_mode = #tpu.pipeline_mode<synchronous>, transform_indices = @transform_2, window_bounds = array<i64: 1, 32>}, {pipeline_mode = #tpu.pipeline_mode<synchronous>, transform_indices = @transform_3, window_bounds = array<i64: 32, 32>}, {pipeline_mode = #tpu.pipeline_mode<synchronous>, transform_indices = @transform_4, window_bounds = array<i64: 1, 32>}, {transform_indices = @transform_5, window_bounds = array<i64: 1, 4, 32>}]} {
    %c0 = arith.constant 0 : index
    %c0_0 = arith.constant 0 : index
    %c0_1 = arith.constant 0 : index
    %0 = vector.load %arg1[%c0, %c0_0, %c0_1] : memref<1x6x128xbf16, #tpu.memory_space<vmem>>, vector<1x4x128xbf16>
    %1 = vector.shape_cast %0 : vector<1x4x128xbf16> to vector<4x128xbf16>
    %c0_2 = arith.constant 0 : index
    %c0_3 = arith.constant 0 : index
    %c0_4 = arith.constant 0 : index
    %2 = vector.load %arg2[%c0_2, %c0_3, %c0_4] : memref<2x128x32xbf16, #tpu.memory_space<vmem>>, vector<1x128x32xbf16>
    %3 = vector.shape_cast %2 : vector<1x128x32xbf16> to vector<128x32xbf16>
    %cst = arith.constant dense<0.000000e+00> : vector<4x32xf32>
    %4 = tpu.matmul %1, %3, %cst {dimension_numbers = #tpu.dot_dimension_numbers<[1], [0], [0], [1], [0, 0, 1, 1], [], []>} : vector<4x128xbf16>, vector<128x32xbf16>, vector<4x32xf32> -> vector<4x32xf32>
    %c0_5 = arith.constant 0 : index
    %c2 = arith.constant 2 : index
    %c0_6 = arith.constant 0 : index
    %5 = vector.load %arg1[%c0_5, %c2, %c0_6] : memref<1x6x128xbf16, #tpu.memory_space<vmem>>, vector<1x4x128xbf16>
    %6 = vector.shape_cast %5 : vector<1x4x128xbf16> to vector<4x128xbf16>
    %c1 = arith.constant 1 : index
    %c0_7 = arith.constant 0 : index
    %c0_8 = arith.constant 0 : index
    %7 = vector.load %arg2[%c1, %c0_7, %c0_8] : memref<2x128x32xbf16, #tpu.memory_space<vmem>>, vector<1x128x32xbf16>
    %8 = vector.shape_cast %7 : vector<1x128x32xbf16> to vector<128x32xbf16>
    %cst_9 = arith.constant dense<0.000000e+00> : vector<4x32xf32>
    %9 = tpu.matmul %6, %8, %cst_9 {dimension_numbers = #tpu.dot_dimension_numbers<[1], [0], [0], [1], [0, 0, 1, 1], [], []>} : vector<4x128xbf16>, vector<128x32xbf16>, vector<4x32xf32> -> vector<4x32xf32>
    %10 = arith.addf %4, %9 : vector<4x32xf32>
    %c0_10 = arith.constant 0 : index
    %c0_11 = arith.constant 0 : index
    %11 = vector.load %arg3[%c0_10, %c0_11] : memref<1x32xf32, #tpu.memory_space<vmem>>, vector<1x32xf32>
    %12 = vector.broadcast %11 : vector<1x32xf32> to vector<4x32xf32>
    %13 = arith.addf %10, %12 : vector<4x32xf32>
    %cst_12 = arith.constant 0.000000e+00 : f32
    %14 = vector.broadcast %cst_12 : f32 to vector<4x32xf32>
    %15 = arith.maximumf %13, %14 : vector<4x32xf32>
    %16 = arith.truncf %15 : vector<4x32xf32> to vector<4x32xbf16>
    %c0_13 = arith.constant 0 : index
    %c0_14 = arith.constant 0 : index
    %17 = vector.load %arg4[%c0_13, %c0_14] : memref<32x32xbf16, #tpu.memory_space<vmem>>, vector<32x32xbf16>
    %cst_15 = arith.constant dense<0.000000e+00> : vector<4x32xf32>
    %18 = tpu.matmul %16, %17, %cst_15 {dimension_numbers = #tpu.dot_dimension_numbers<[1], [0], [0], [1], [0, 0, 1, 1], [], []>} : vector<4x32xbf16>, vector<32x32xbf16>, vector<4x32xf32> -> vector<4x32xf32>
    %c0_16 = arith.constant 0 : index
    %c0_17 = arith.constant 0 : index
    %19 = vector.load %arg5[%c0_16, %c0_17] : memref<1x32xf32, #tpu.memory_space<vmem>>, vector<1x32xf32>
    %20 = vector.broadcast %19 : vector<1x32xf32> to vector<4x32xf32>
    %21 = arith.addf %18, %20 : vector<4x32xf32>
    %c0_18 = arith.constant 0 : index
    %c0_19 = arith.constant 0 : index
    %c0_20 = arith.constant 0 : index
    %22 = vector.load %arg6[%c0_18, %c0_19, %c0_20] : memref<1x4x32xf32, #tpu.memory_space<vmem>>, vector<1x4x32xf32>
    %23 = vector.shape_cast %22 : vector<1x4x32xf32> to vector<4x32xf32>
    %24 = vector.shape_cast %21 : vector<4x32xf32> to vector<1x4x32xf32>
    tpu.vector_store %arg6[%c0_18, %c0_19, %c0_20], %24 {strides = array<i32>} : memref<1x4x32xf32, #tpu.memory_space<vmem>>, vector<1x4x32xf32>,
    return
  }
  func.func @transform_0(%arg0: i32) -> (i32, i32, i32) {
    %c0_i32 = arith.constant 0 : i32
    %c0_i32_0 = arith.constant 0 : i32
    %c0_i32_1 = arith.constant 0 : i32
    return %arg0, %c0_i32, %c0_i32_0 : i32, i32, i32
  }
  func.func @transform_1(%arg0: i32) -> (i32, i32, i32) {
    %c0_i32 = arith.constant 0 : i32
    %c0_i32_0 = arith.constant 0 : i32
    %c0_i32_1 = arith.constant 0 : i32
    %c0_i32_2 = arith.constant 0 : i32
    return %c0_i32, %c0_i32_0, %c0_i32_1 : i32, i32, i32
  }
  func.func @transform_2(%arg0: i32) -> (i32, i32) {
    %c0_i32 = arith.constant 0 : i32
    %c0_i32_0 = arith.constant 0 : i32
    %c0_i32_1 = arith.constant 0 : i32
    return %c0_i32, %c0_i32_0 : i32, i32
  }
  func.func @transform_3(%arg0: i32) -> (i32, i32) {
    %c0_i32 = arith.constant 0 : i32
    %c0_i32_0 = arith.constant 0 : i32
    %c0_i32_1 = arith.constant 0 : i32
    return %c0_i32, %c0_i32_0 : i32, i32
  }
  func.func @transform_4(%arg0: i32) -> (i32, i32) {
    %c0_i32 = arith.constant 0 : i32
    %c0_i32_0 = arith.constant 0 : i32
    %c0_i32_1 = arith.constant 0 : i32
    return %c0_i32, %c0_i32_0 : i32, i32
  }
  func.func @transform_5(%arg0: i32) -> (i32, i32, i32) {
    %c0_i32 = arith.constant 0 : i32
    %c0_i32_0 = arith.constant 0 : i32
    %c0_i32_1 = arith.constant 0 : i32
    return %arg0, %c0_i32, %c0_i32_0 : i32, i32, i32
  }
}

</mosaic_0001>

<bundles_post_ra>
// kernel: conv_stem_forward.4
= control target key start
LH: loop header
LB: loop body
LE: loop exit
PB: predicated region body
PF: predicated region fallthrough
CT: control target
= control target key end

     0   :  { %s1004_s12 = smov 0   ;;  %s1174_s0 = inlined_call_operand.vmem [shape: bf16[2,256,48], index: 0, kind: input, shape index: {}]   ;;  %s1175_s1 = inlined_call_operand.vmem [shape: bf16[1,48,4], index: 1, kind: input, shape index: {}]   ;;  %s1176_s2 = inlined_call_operand.vmem [shape: f32[1,4], index: 2, kind: input, shape index: {}]   ;;  %s1177_s3 = inlined_call_operand.vmem [shape: bf16[2,256,4], index: 3, kind: output, shape index: {}]  }
   0x1 LB: > { %s773_s13 = sadd.s32 4294967295, %s982_s12   ;;  %p777_p0 = scmp.ge.s32.totalorder %s982_s12, 1  ;;  %s982_s12 = sphi %s1004_s12, %s13_s12  }
   0x2   : > { %p137_p1 = scmp.lt.s32.totalorder %s982_s12, 3 }
   0x4   : > { %p138_p2 = pnand %p777_p0, %p137_p1 }
   0x5   : > { %p161_p3 = scmp.lt.s32.totalorder (!%p138_p2), %s773_s13, 1 }
   0x6   : > { %141 = sbr.rel (%p138_p2) target bundleno = 255 (0xff), region = 32 }
   0xb   : > { %v957_v0 = vld [vmem:[%s1175_s1 + $0x10] sm:$0xff]   ;;  %v958_v1 = vld [vmem:[%s1175_s1 + $0x8] sm:$0xff]   ;;  %s1179_s13 = smov (!%p161_p3, %s773_s13), 1  ;;  %v959_v2 = vld [vmem:[%s1175_s1] sm:$0xff]   ;;  %vm315_vm0 = vcmask 392192   ;;  %vm685_vm1 = vcmask 27648  }
   0xc   : > { %905 = vmatprep.subr.bf16.mxu0 %v957_v0  ;;  %943 = vmatprep.subr.bf16.mxu1 %v957_v0  ;;  %s852_s20 = sshll.u32 %s1179_s13, 7  ;;  %v1066_v19 = vld [vmem:[%s1176_s2] ss:$0 sm:$0xff] }
   0xd   : > { %906 = vmatpush3.bf16.msra.mxu0 %v957_v0  ;;  %946 = vmatpush3.bf16.msra.mxu1 %v957_v0  ;;  %s1029_s23 = scalar_lea.vmem %s1174_s0, %s852_s20  ;;  %s1077_s28 = scalar_lea.vmem %s1177_s3, %s852_s20 }
   0xe   : > { %907 = vmatprep.subr.bf16.mxu0 %v958_v1  ;;  %944 = vmatprep.subr.bf16.mxu1 %v958_v1  ;;  %v960_v3 = vld [vmem:[%s1029_s23] sm:$0xff]   ;;  %v962_v5 = vld [vmem:[%s1029_s23 + $0x8] sm:$0xff]   ;;  %v964_v7 = vld [vmem:[%s1029_s23 + $0x10] sm:$0xff]  }
   0xf   : > { %v961_v4 = vld [vmem:[%s1029_s23 + $0x40] sm:$0xff]   ;;  %911 = vmatprep.mubr.msk.bf16.mxu0 %vm315_vm0, %v960_v3  ;;  %v963_v6 = vld [vmem:[%s1029_s23 + $0x48] sm:$0xff]   ;;  %v965_v8 = vld [vmem:[%s1029_s23 + $0x50] sm:$0xff]  }
  0x10   : > { %927 = vmatprep.mubr.msk.bf16.mxu1 %vm315_vm0, %v961_v4  ;;  %v966_v9 = vld [vmem:[%s1029_s23 + $0x18] sm:$0xff]   ;;  %v968_v11 = vld [vmem:[%s1029_s23 + $0x20] sm:$0xff]   ;;  %v970_v13 = vld [vmem:[%s1029_s23 + $0x28] sm:$0xff]  }
  0x11   : > { %908 = vmatpush3.bf16.msra.mxu0 %v958_v1  ;;  %947 = vmatpush3.bf16.msra.mxu1 %v958_v1  ;;  %v967_v10 = vld [vmem:[%s1029_s23 + $0x58] sm:$0xff]   ;;  %v969_v12 = vld [vmem:[%s1029_s23 + $0x60] sm:$0xff]   ;;  %v971_v14 = vld [vmem:[%s1029_s23 + $0x68] sm:$0xff]  }
  0x12   : > { %909 = vmatprep.subr.bf16.mxu0 %v959_v2  ;;  %945 = vmatprep.subr.bf16.mxu1 %v959_v2  ;;  %v972_v15 = vld [vmem:[%s1029_s23 + $0x30] sm:$0xff]   ;;  %v974_v17 = vld [vmem:[%s1029_s23 + $0x38] sm:$0xff]  }
  0x13   : > { %v973_v16 = vld [vmem:[%s1029_s23 + $0x70] sm:$0xff]   ;;  %v975_v18 = vld [vmem:[%s1029_s23 + $0x78] sm:$0xff]  }
  0x15   : > { %910 = vmatpush3.bf16.msra.mxu0 %v959_v2  ;;  %948 = vmatpush3.bf16.msra.mxu1 %v959_v2 }
  0x18   : > { %912 = vmatmul.mubr.msk.bf16.vlgmr.msra.gmra.mxu0 %vm315_vm0, %v962_v5  ;;  %928 = vmatmul.mubr.msk.bf16.vlgmr.msra.gmra.mxu1 %vm315_vm0, %v963_v6 }
  0x19   : > { %915 = vmatprep.mubr.msk.bf16.mxu0 %vm315_vm0, %v964_v7  ;;  %931 = vmatprep.mubr.msk.bf16.mxu1 %vm315_vm0, %v965_v8 }
  0x20   : > { %916 = vmatmul.mubr.msk.bf16.gmra.mxu0 %vm315_vm0, %v966_v9  ;;  %932 = vmatmul.mubr.msk.bf16.gmra.mxu1 %vm315_vm0, %v967_v10 }
  0x21   : > { %919 = vmatprep.mubr.msk.bf16.mxu0 %vm315_vm0, %v968_v11  ;;  %935 = vmatprep.mubr.msk.bf16.mxu1 %vm315_vm0, %v969_v12 }
  0x28   : > { %920 = vmatmul.mubr.msk.bf16.gmra.mxu0 %vm315_vm0, %v970_v13  ;;  %936 = vmatmul.mubr.msk.bf16.gmra.mxu1 %vm315_vm0, %v971_v14 }
  0x29   : > { %923 = vmatprep.mubr.msk.bf16.mxu0 %vm315_vm0, %v972_v15  ;;  %939 = vmatprep.mubr.msk.bf16.mxu1 %vm315_vm0, %v973_v16 }
  0x30   : > { %924 = vmatmul.mubr.msk.bf16.gmra.mxu0 %vm315_vm0, %v974_v17  ;;  %940 = vmatmul.mubr.msk.bf16.gmra.mxu1 %vm315_vm0, %v975_v18 }
  0xd8   : > { %v913_v20 = vpop.f32.mrf.mxu0  ;;  %v929_v21 = vpop.f32.mrf.mxu1 }
  0xd9   : > { %v407_v22 = vadd.f32 %v913_v20, %v1066_v19  ;;  %v471_v23 = vadd.f32 %v929_v21, %v1066_v19 }
  0xda   : > { %v398_v24 = vpop.f32.mrf.mxu0  ;;  %v462_v25 = vpop.f32.mrf.mxu1 }
  0xdb   : > { %v527_v26 = vmax.f32 %v407_v22, 0.0  ;;  %v543_v27 = vmax.f32 %v471_v23, 0.0  ;;  %v399_v28 = vadd.f32 %v1066_v19, %v398_v24  ;;  %v463_v29 = vadd.f32 %v1066_v19, %v462_v25 }
  0xdc   : > { %v914_v30 = vpop.f32.mrf.mxu0  ;;  %v930_v31 = vpop.f32.mrf.mxu1 }
  0xdd   : > { %v856_v32 = vpack.c.bf16 %v527_v26, %v527_v26  ;;  %v872_v33 = vpack.c.bf16 %v543_v27, %v543_v27  ;;  %v525_v34 = vmax.f32 %v399_v28, 0.0  ;;  %v541_v35 = vmax.f32 %v463_v29, 0.0 }
  0xde   : > { %v410_v36 = vadd.f32 %v914_v30, %v1066_v19  ;;  %v474_v37 = vadd.f32 %v930_v31, %v1066_v19  ;;  %v401_v38 = vpop.f32.mrf.mxu0  ;;  %v465_v39 = vpop.f32.mrf.mxu1 }
  0xdf   : > { %688 = vst.msk [vmem:[%s1077_s28 + $0x8] sm:$0xf] %vm685_vm1, %v856_v32  ;;  %704 = vst.msk [vmem:[%s1077_s28 + $0x48] sm:$0xf] %vm685_vm1, %v872_v33  ;;  %v854_v40 = vpack.c.bf16 %v525_v34, %v525_v34  ;;  %v870_v41 = vpack.c.bf16 %v541_v35, %v541_v35  ;;  %v402_v42 = vadd.f32 %v1066_v19, %v401_v38 }
  0xe0   : > { %v466_v43 = vadd.f32 %v1066_v19, %v465_v39  ;;  %v528_v44 = vmax.f32 %v410_v36, 0.0  ;;  %v544_v45 = vmax.f32 %v474_v37, 0.0  ;;  %v917_v46 = vpop.f32.mrf.mxu0  ;;  %v933_v47 = vpop.f32.mrf.mxu1 }
  0xe1   : > { %686 = vst.msk [vmem:[%s1077_s28] sm:$0xf] %vm685_vm1, %v854_v40  ;;  %702 = vst.msk [vmem:[%s1077_s28 + $0x40] sm:$0xf] %vm685_vm1, %v870_v41  ;;  %v526_v48 = vmax.f32 %v402_v42, 0.0  ;;  %v423_v50 = vadd.f32 %v917_v46, %v1066_v19  ;;  %v487_v51 = vadd.f32 %v933_v47, %v1066_v19 }
  0xe2   : > { %v542_v49 = vmax.f32 %v466_v43, 0.0  ;;  %v857_v52 = vpack.c.bf16 %v528_v44, %v528_v44  ;;  %v873_v53 = vpack.c.bf16 %v544_v45, %v544_v45  ;;  %v414_v54 = vpop.f32.mrf.mxu0  ;;  %v478_v55 = vpop.f32.mrf.mxu1 }
  0xe3   : > { %v855_v56 = vpack.c.bf16 %v526_v48, %v526_v48  ;;  %v531_v58 = vmax.f32 %v423_v50, 0.0  ;;  %v547_v59 = vmax.f32 %v487_v51, 0.0  ;;  %v415_v60 = vadd.f32 %v1066_v19, %v414_v54 }
  0xe4   : > { %v871_v57 = vpack.c.bf16 %v542_v49, %v542_v49  ;;  %689 = vst.msk [vmem:[%s1077_s28 + $0xc] sm:$0xf] %vm685_vm1, %v857_v52  ;;  %705 = vst.msk [vmem:[%s1077_s28 + $0x4c] sm:$0xf] %vm685_vm1, %v873_v53  ;;  %v479_v61 = vadd.f32 %v1066_v19, %v478_v55  ;;  %v918_v62 = vpop.f32.mrf.mxu0  ;;  %v934_v63 = vpop.f32.mrf.mxu1 }
  0xe5   : > { %687 = vst.msk [vmem:[%s1077_s28 + $0x4] sm:$0xf] %vm685_vm1, %v855_v56  ;;  %v860_v0 = vpack.c.bf16 %v531_v58, %v531_v58  ;;  %v876_v1 = vpack.c.bf16 %v547_v59, %v547_v59  ;;  %v426_v2 = vadd.f32 %v918_v62, %v1066_v19  ;;  %v490_v3 = vadd.f32 %v934_v63, %v1066_v19 }
  0xe6   : > { %703 = vst.msk [vmem:[%s1077_s28 + $0x44] sm:$0xf] %vm685_vm1, %v871_v57  ;;  %v529_v4 = vmax.f32 %v415_v60, 0.0  ;;  %v545_v5 = vmax.f32 %v479_v61, 0.0  ;;  %v417_v6 = vpop.f32.mrf.mxu0  ;;  %v481_v7 = vpop.f32.mrf.mxu1 }
  0xe7   : > { %692 = vst.msk [vmem:[%s1077_s28 + $0x18] sm:$0xf] %vm685_vm1, %v860_v0  ;;  %708 = vst.msk [vmem:[%s1077_s28 + $0x58] sm:$0xf] %vm685_vm1, %v876_v1  ;;  %v532_v8 = vmax.f32 %v426_v2, 0.0  ;;  %v548_v9 = vmax.f32 %v490_v3, 0.0  ;;  %v418_v10 = vadd.f32 %v1066_v19, %v417_v6  ;;  %v482_v11 = vadd.f32 %v1066_v19, %v481_v7 }
  0xe8   : > { %v858_v12 = vpack.c.bf16 %v529_v4, %v529_v4  ;;  %v874_v13 = vpack.c.bf16 %v545_v5, %v545_v5  ;;  %v921_v14 = vpop.f32.mrf.mxu0  ;;  %v937_v15 = vpop.f32.mrf.mxu1 }
  0xe9   : > { %v861_v16 = vpack.c.bf16 %v532_v8, %v532_v8  ;;  %v877_v17 = vpack.c.bf16 %v548_v9, %v548_v9  ;;  %v530_v18 = vmax.f32 %v418_v10, 0.0  ;;  %v546_v20 = vmax.f32 %v482_v11, 0.0 }
  0xea   : > { %690 = vst.msk [vmem:[%s1077_s28 + $0x10] sm:$0xf] %vm685_vm1, %v858_v12  ;;  %706 = vst.msk [vmem:[%s1077_s28 + $0x50] sm:$0xf] %vm685_vm1, %v874_v13  ;;  %v439_v21 = vadd.f32 %v921_v14, %v1066_v19  ;;  %v503_v22 = vadd.f32 %v937_v15, %v1066_v19  ;;  %v430_v23 = vpop.f32.mrf.mxu0  ;;  %v494_v24 = vpop.f32.mrf.mxu1 }
  0xeb   : > { %693 = vst.msk [vmem:[%s1077_s28 + $0x1c] sm:$0xf] %vm685_vm1, %v861_v16  ;;  %709 = vst.msk [vmem:[%s1077_s28 + $0x5c] sm:$0xf] %vm685_vm1, %v877_v17  ;;  %v859_v25 = vpack.c.bf16 %v530_v18, %v530_v18  ;;  %v875_v26 = vpack.c.bf16 %v546_v20, %v546_v20  ;;  %v431_v27 = vadd.f32 %v1066_v19, %v430_v23 }
  0xec   : > { %v495_v28 = vadd.f32 %v1066_v19, %v494_v24  ;;  %v535_v29 = vmax.f32 %v439_v21, 0.0  ;;  %v551_v30 = vmax.f32 %v503_v22, 0.0  ;;  %v922_v31 = vpop.f32.mrf.mxu0  ;;  %v938_v32 = vpop.f32.mrf.mxu1 }
  0xed   : > { %691 = vst.msk [vmem:[%s1077_s28 + $0x14] sm:$0xf] %vm685_vm1, %v859_v25  ;;  %707 = vst.msk [vmem:[%s1077_s28 + $0x54] sm:$0xf] %vm685_vm1, %v875_v26  ;;  %v533_v33 = vmax.f32 %v431_v27, 0.0  ;;  %v442_v35 = vadd.f32 %v922_v31, %v1066_v19  ;;  %v506_v36 = vadd.f32 %v938_v32, %v1066_v19 }
  0xee   : > { %v549_v34 = vmax.f32 %v495_v28, 0.0  ;;  %v864_v37 = vpack.c.bf16 %v535_v29, %v535_v29  ;;  %v880_v38 = vpack.c.bf16 %v551_v30, %v551_v30  ;;  %v433_v39 = vpop.f32.mrf.mxu0  ;;  %v497_v40 = vpop.f32.mrf.mxu1 }
  0xef   : > { %v862_v41 = vpack.c.bf16 %v533_v33, %v533_v33  ;;  %v536_v43 = vmax.f32 %v442_v35, 0.0  ;;  %v552_v44 = vmax.f32 %v506_v36, 0.0  ;;  %v434_v45 = vadd.f32 %v1066_v19, %v433_v39 }
  0xf0   : > { %v878_v42 = vpack.c.bf16 %v549_v34, %v549_v34  ;;  %696 = vst.msk [vmem:[%s1077_s28 + $0x28] sm:$0xf] %vm685_vm1, %v864_v37  ;;  %712 = vst.msk [vmem:[%s1077_s28 + $0x68] sm:$0xf] %vm685_vm1, %v880_v38  ;;  %v498_v46 = vadd.f32 %v1066_v19, %v497_v40  ;;  %v925_v47 = vpop.f32.mrf.mxu0  ;;  %v941_v48 = vpop.f32.mrf.mxu1 }
  0xf1   : > { %694 = vst.msk [vmem:[%s1077_s28 + $0x20] sm:$0xf] %vm685_vm1, %v862_v41  ;;  %v865_v49 = vpack.c.bf16 %v536_v43, %v536_v43  ;;  %v881_v50 = vpack.c.bf16 %v552_v44, %v552_v44  ;;  %v455_v51 = vadd.f32 %v925_v47, %v1066_v19  ;;  %v519_v52 = vadd.f32 %v941_v48, %v1066_v19 }
  0xf2   : > { %710 = vst.msk [vmem:[%s1077_s28 + $0x60] sm:$0xf] %vm685_vm1, %v878_v42  ;;  %v534_v53 = vmax.f32 %v434_v45, 0.0  ;;  %v550_v54 = vmax.f32 %v498_v46, 0.0  ;;  %v446_v55 = vpop.f32.mrf.mxu0  ;;  %v510_v56 = vpop.f32.mrf.mxu1 }
  0xf3   : > { %697 = vst.msk [vmem:[%s1077_s28 + $0x2c] sm:$0xf] %vm685_vm1, %v865_v49  ;;  %713 = vst.msk [vmem:[%s1077_s28 + $0x6c] sm:$0xf] %vm685_vm1, %v881_v50  ;;  %v539_v57 = vmax.f32 %v455_v51, 0.0  ;;  %v555_v58 = vmax.f32 %v519_v52, 0.0  ;;  %v447_v59 = vadd.f32 %v1066_v19, %v446_v55  ;;  %v511_v60 = vadd.f32 %v1066_v19, %v510_v56 }
  0xf4   : > { %v863_v61 = vpack.c.bf16 %v534_v53, %v534_v53  ;;  %v879_v62 = vpack.c.bf16 %v550_v54, %v550_v54  ;;  %v926_v63 = vpop.f32.mrf.mxu0  ;;  %v942_v0 = vpop.f32.mrf.mxu1 }
  0xf5   : > { %v868_v1 = vpack.c.bf16 %v539_v57, %v539_v57  ;;  %v884_v2 = vpack.c.bf16 %v555_v58, %v555_v58  ;;  %v537_v3 = vmax.f32 %v447_v59, 0.0  ;;  %v553_v4 = vmax.f32 %v511_v60, 0.0 }
  0xf6   : > { %695 = vst.msk [vmem:[%s1077_s28 + $0x24] sm:$0xf] %vm685_vm1, %v863_v61  ;;  %711 = vst.msk [vmem:[%s1077_s28 + $0x64] sm:$0xf] %vm685_vm1, %v879_v62  ;;  %v458_v5 = vadd.f32 %v926_v63, %v1066_v19  ;;  %v522_v6 = vadd.f32 %v942_v0, %v1066_v19  ;;  %v449_v7 = vpop.f32.mrf.mxu0  ;;  %v513_v8 = vpop.f32.mrf.mxu1 }
  0xf7   : > { %700 = vst.msk [vmem:[%s1077_s28 + $0x38] sm:$0xf] %vm685_vm1, %v868_v1  ;;  %716 = vst.msk [vmem:[%s1077_s28 + $0x78] sm:$0xf] %vm685_vm1, %v884_v2  ;;  %v866_v9 = vpack.c.bf16 %v537_v3, %v537_v3  ;;  %v882_v10 = vpack.c.bf16 %v553_v4, %v553_v4  ;;  %v450_v11 = vadd.f32 %v1066_v19, %v449_v7 }
  0xf8   : > { %v514_v12 = vadd.f32 %v1066_v19, %v513_v8  ;;  %v540_v13 = vmax.f32 %v458_v5, 0.0  ;;  %v556_v14 = vmax.f32 %v522_v6, 0.0 }
  0xf9   : > { %698 = vst.msk [vmem:[%s1077_s28 + $0x30] sm:$0xf] %vm685_vm1, %v866_v9  ;;  %714 = vst.msk [vmem:[%s1077_s28 + $0x70] sm:$0xf] %vm685_vm1, %v882_v10  ;;  %v538_v15 = vmax.f32 %v450_v11, 0.0 }
  0xfa   : > { %v554_v16 = vmax.f32 %v514_v12, 0.0  ;;  %v869_v17 = vpack.c.bf16 %v540_v13, %v540_v13  ;;  %v885_v18 = vpack.c.bf16 %v556_v14, %v556_v14 }
  0xfb   : > { %v867_v20 = vpack.c.bf16 %v538_v15, %v538_v15 }
  0xfc   : > { %v883_v21 = vpack.c.bf16 %v554_v16, %v554_v16  ;;  %701 = vst.msk [vmem:[%s1077_s28 + $0x3c] sm:$0xf] %vm685_vm1, %v869_v17  ;;  %717 = vst.msk [vmem:[%s1077_s28 + $0x7c] sm:$0xf] %vm685_vm1, %v885_v18 }
  0xfd   : > { %699 = vst.msk [vmem:[%s1077_s28 + $0x34] sm:$0xf] %vm685_vm1, %v867_v20 }
  0xfe   : > { %715 = vst.msk [vmem:[%s1077_s28 + $0x74] sm:$0xf] %vm685_vm1, %v883_v21 }
  0xff PF: > { %s13_s12 = sadd.s32 1, %s982_s12  }
 0x100   : > { %p10_p4 = scmp.ge.s32.totalorder %s13_s12, 4  }
 0x102   :  { %12 = sbr.rel (!%p10_p4) target bundleno = 1 (0x1), region = 62 }

// kernel: conv_stem_forward.5
= control target key start
LH: loop header
LB: loop body
LE: loop exit
PB: predicated region body
PF: predicated region fallthrough
CT: control target
= control target key end

     0   :  { %s539_s12 = smov 0   ;;  %s600_s0 = inlined_call_operand.vmem [shape: bf16[2,64,64], index: 0, kind: input, shape index: {}]   ;;  %s601_s1 = inlined_call_operand.vmem [shape: bf16[1,64,8], index: 1, kind: input, shape index: {}]   ;;  %s602_s2 = inlined_call_operand.vmem [shape: f32[1,8], index: 2, kind: input, shape index: {}]   ;;  %s603_s3 = inlined_call_operand.vmem [shape: bf16[2,64,8], index: 3, kind: output, shape index: {}]  }
   0x1 LB: > { %s421_s13 = sadd.s32 4294967295, %s517_s12   ;;  %p425_p0 = scmp.ge.s32.totalorder %s517_s12, 1  ;;  %s517_s12 = sphi %s539_s12, %s13_s12  }
   0x2   : > { %p137_p1 = scmp.lt.s32.totalorder %s517_s12, 3 }
   0x4   : > { %p138_p2 = pnand %p425_p0, %p137_p1 }
   0x5   : > { %p161_p3 = scmp.lt.s32.totalorder (!%p138_p2), %s421_s13, 1 }
   0x6   : > { %141 = sbr.rel (%p138_p2) target bundleno = 235 (0xeb), region = 32 }
   0xb   : > { %v503_v0 = vld [vmem:[%s601_s1 + $0x18] sm:$0xff]   ;;  %v504_v1 = vld [vmem:[%s601_s1 + $0x10] sm:$0xff]   ;;  %s605_s13 = smov (!%p161_p3, %s421_s13), 1  ;;  %v505_v2 = vld [vmem:[%s601_s1 + $0x8] sm:$0xff]   ;;  %vm239_vm0 = vcmask 523264   ;;  %vm357_vm1 = vcmask 60416  }
   0xc   : > { %471 = vmatprep.subr.bf16.mxu0 %v503_v0  ;;  %487 = vmatprep.subr.bf16.mxu1 %v503_v0  ;;  %s453_s20 = sshll.u32 %s605_s13, 5  ;;  %v506_v5 = vld [vmem:[%s601_s1] sm:$0xff]  }
   0xd   : > { %472 = vmatpush3.bf16.msra.mxu0 %v503_v0  ;;  %491 = vmatpush3.bf16.msra.mxu1 %v503_v0  ;;  %s165_s23 = scalar_lea.vmem %s600_s0, %s453_s20  ;;  %v430_v8 = vld [vmem:[%s602_s2] ss:$0 sm:$0xff]  ;;  %s579_s30 = scalar_lea.vmem %s603_s3, %s453_s20 }
   0xe   : > { %473 = vmatprep.subr.bf16.mxu0 %v504_v1  ;;  %488 = vmatprep.subr.bf16.mxu1 %v504_v1  ;;  %v507_v3 = vld [vmem:[%s165_s23] sm:$0xff]   ;;  %v508_v4 = vld [vmem:[%s165_s23 + $0x10] sm:$0xff]   ;;  %v509_v6 = vld [vmem:[%s165_s23 + $0x8] sm:$0xff]  }
   0xf   : > { %479 = vmatprep.mubr.msk.bf16.mxu0 %vm239_vm0, %v507_v3  ;;  %483 = vmatprep.mubr.msk.bf16.mxu1 %vm239_vm0, %v508_v4  ;;  %v510_v7 = vld [vmem:[%s165_s23 + $0x18] sm:$0xff]  }
  0x11   : > { %474 = vmatpush3.bf16.msra.mxu0 %v504_v1  ;;  %492 = vmatpush3.bf16.msra.mxu1 %v504_v1 }
  0x12   : > { %475 = vmatprep.subr.bf16.mxu0 %v505_v2  ;;  %489 = vmatprep.subr.bf16.mxu1 %v505_v2 }
  0x15   : > { %476 = vmatpush3.bf16.msra.mxu0 %v505_v2  ;;  %493 = vmatpush3.bf16.msra.mxu1 %v505_v2 }
  0x16   : > { %477 = vmatprep.subr.bf16.mxu0 %v506_v5  ;;  %490 = vmatprep.subr.bf16.mxu1 %v506_v5 }
  0x19   : > { %478 = vmatpush3.bf16.msra.mxu0 %v506_v5  ;;  %494 = vmatpush3.bf16.msra.mxu1 %v506_v5 }
  0x1c   : > { %480 = vmatmul.mubr.msk.bf16.vlgmr.msra.gmra.mxu0 %vm239_vm0, %v509_v6  ;;  %484 = vmatmul.mubr.msk.bf16.vlgmr.msra.gmra.mxu1 %vm239_vm0, %v510_v7 }
  0xdc   : > { %v481_v9 = vpop.f32.mrf.mxu0  ;;  %v485_v10 = vpop.f32.mrf.mxu1 }
  0xdd   : > { %v295_v11 = vadd.f32 %v481_v9, %v430_v8  ;;  %v311_v12 = vadd.f32 %v485_v10, %v430_v8 }
  0xde   : > { %v286_v13 = vpop.f32.mrf.mxu0  ;;  %v302_v14 = vpop.f32.mrf.mxu1 }
  0xdf   : > { %v319_v15 = vmax.f32 %v295_v11, 0.0  ;;  %v323_v16 = vmax.f32 %v311_v12, 0.0  ;;  %v287_v17 = vadd.f32 %v430_v8, %v286_v13  ;;  %v303_v18 = vadd.f32 %v430_v8, %v302_v14 }
  0xe0   : > { %v482_v19 = vpop.f32.mrf.mxu0  ;;  %v486_v20 = vpop.f32.mrf.mxu1 }
  0xe1   : > { %v457_v21 = vpack.c.bf16 %v319_v15, %v319_v15  ;;  %v461_v22 = vpack.c.bf16 %v323_v16, %v323_v16  ;;  %v317_v23 = vmax.f32 %v287_v17, 0.0  ;;  %v321_v24 = vmax.f32 %v303_v18, 0.0 }
  0xe2   : > { %v298_v25 = vadd.f32 %v482_v19, %v430_v8  ;;  %v314_v26 = vadd.f32 %v486_v20, %v430_v8  ;;  %v289_v27 = vpop.f32.mrf.mxu0  ;;  %v305_v28 = vpop.f32.mrf.mxu1 }
  0xe3   : > { %360 = vst.msk [vmem:[%s579_s30 + $0x8] sm:$0xf] %vm357_vm1, %v457_v21  ;;  %364 = vst.msk [vmem:[%s579_s30 + $0x18] sm:$0xf] %vm357_vm1, %v461_v22  ;;  %v455_v29 = vpack.c.bf16 %v317_v23, %v317_v23  ;;  %v459_v30 = vpack.c.bf16 %v321_v24, %v321_v24  ;;  %v290_v31 = vadd.f32 %v430_v8, %v289_v27 }
  0xe4   : > { %v306_v32 = vadd.f32 %v430_v8, %v305_v28  ;;  %v320_v33 = vmax.f32 %v298_v25, 0.0  ;;  %v324_v34 = vmax.f32 %v314_v26, 0.0 }
  0xe5   : > { %358 = vst.msk [vmem:[%s579_s30] sm:$0xf] %vm357_vm1, %v455_v29  ;;  %362 = vst.msk [vmem:[%s579_s30 + $0x10] sm:$0xf] %vm357_vm1, %v459_v30  ;;  %v318_v35 = vmax.f32 %v290_v31, 0.0 }
  0xe6   : > { %v322_v36 = vmax.f32 %v306_v32, 0.0  ;;  %v458_v37 = vpack.c.bf16 %v320_v33, %v320_v33  ;;  %v462_v38 = vpack.c.bf16 %v324_v34, %v324_v34 }
  0xe7   : > { %v456_v39 = vpack.c.bf16 %v318_v35, %v318_v35 }
  0xe8   : > { %v460_v40 = vpack.c.bf16 %v322_v36, %v322_v36  ;;  %361 = vst.msk [vmem:[%s579_s30 + $0xc] sm:$0xf] %vm357_vm1, %v458_v37  ;;  %365 = vst.msk [vmem:[%s579_s30 + $0x1c] sm:$0xf] %vm357_vm1, %v462_v38 }
  0xe9   : > { %359 = vst.msk [vmem:[%s579_s30 + $0x4] sm:$0xf] %vm357_vm1, %v456_v39 }
  0xea   : > { %363 = vst.msk [vmem:[%s579_s30 + $0x14] sm:$0xf] %vm357_vm1, %v460_v40 }
  0xeb PF: > { %s13_s12 = sadd.s32 1, %s517_s12  }
  0xec   : > { %p10_p4 = scmp.ge.s32.totalorder %s13_s12, 4  }
  0xee   :  { %12 = sbr.rel (!%p10_p4) target bundleno = 1 (0x1), region = 62 }

// kernel: conv_stem_forward.6
= control target key start
LH: loop header
LB: loop body
LE: loop exit
PB: predicated region body
PF: predicated region fallthrough
CT: control target
= control target key end

     0   :  { %s465_s12 = smov 0   ;;  %s512_s0 = inlined_call_operand.vmem [shape: bf16[2,16,128], index: 0, kind: input, shape index: {}]   ;;  %s513_s1 = inlined_call_operand.vmem [shape: bf16[1,128,16], index: 1, kind: input, shape index: {}]   ;;  %s514_s2 = inlined_call_operand.vmem [shape: f32[1,16], index: 2, kind: input, shape index: {}]   ;;  %s515_s3 = inlined_call_operand.vmem [shape: bf16[2,16,16], index: 3, kind: output, shape index: {}]  }
   0x1 LB: > { %s360_s13 = sadd.s32 4294967295, %s441_s12   ;;  %p364_p0 = scmp.ge.s32.totalorder %s441_s12, 1  ;;  %s441_s12 = sphi %s465_s12, %s13_s12  }
   0x2   : > { %p137_p1 = scmp.lt.s32.totalorder %s441_s12, 3 }
   0x4   : > { %p138_p2 = pnand %p364_p0, %p137_p1 }
   0x5   : > { %p161_p3 = scmp.lt.s32.totalorder (!%p138_p2), %s360_s13, 1 }
   0x6   : > { %141 = sbr.rel (%p138_p2) target bundleno = 248 (0xf8), region = 32 }
   0xb   : > { %v426_v0 = vld [vmem:[%s513_s1 + $0x38] sm:$0xff]   ;;  %v443_v1 = vmov 0.0   ;;  %v427_v2 = vld [vmem:[%s513_s1 + $0x30] sm:$0xff]   ;;  %vm444_vm0 = vmmov 0   ;;  %s517_s13 = smov (!%p161_p3, %s360_s13), 1  ;;  %v428_v3 = vld [vmem:[%s513_s1 + $0x28] sm:$0xff]  }
   0xc   : > { %396 = vmatprep.subr.bf16.mxu0 %v443_v1  ;;  %412 = vmatprep.mubr.msk.bf16.mxu0 %vm444_vm0, %v443_v1  ;;  %s383_s20 = sshll.u32 %s517_s13, 3  ;;  %v429_v4 = vld [vmem:[%s513_s1 + $0x20] sm:$0xff]   ;;  %v430_v5 = vld [vmem:[%s513_s1 + $0x18] sm:$0xff]   ;;  %v431_v6 = vld [vmem:[%s513_s1 + $0x10] sm:$0xff]   ;;  %vm302_vm1 = vcmask 125952  }
   0xd   : > { %397 = vmatpush3.bf16.msra.mxu0 %v426_v0  ;;  %s165_s23 = scalar_lea.vmem %s512_s0, %s383_s20  ;;  %v432_v7 = vld [vmem:[%s513_s1 + $0x8] sm:$0xff]   ;;  %v433_v8 = vld [vmem:[%s513_s1] sm:$0xff]   ;;  %s170_s11 = scalar_lea.vmem %s515_s3, %s383_s20 }
   0xe   : > { %398 = vmatprep.subr.bf16.mxu0 %v443_v1  ;;  %v434_v9 = vld [vmem:[%s165_s23] sm:$0xff]  }
   0xf   : > { %v369_v10 = vld [vmem:[%s514_s2] ss:$0 sm:$0xff] }
  0x11   : > { %399 = vmatpush3.bf16.msra.mxu0 %v427_v2 }
  0x12   : > { %400 = vmatprep.subr.bf16.mxu0 %v443_v1 }
  0x15   : > { %401 = vmatpush3.bf16.msra.mxu0 %v428_v3 }
  0x16   : > { %402 = vmatprep.subr.bf16.mxu0 %v443_v1 }
  0x19   : > { %403 = vmatpush3.bf16.msra.mxu0 %v429_v4 }
  0x1a   : > { %404 = vmatprep.subr.bf16.mxu0 %v443_v1 }
  0x1d   : > { %405 = vmatpush3.bf16.msra.mxu0 %v430_v5 }
  0x1e   : > { %406 = vmatprep.subr.bf16.mxu0 %v443_v1 }
  0x21   : > { %407 = vmatpush3.bf16.msra.mxu0 %v431_v6 }
  0x22   : > { %408 = vmatprep.subr.bf16.mxu0 %v443_v1 }
  0x25   : > { %409 = vmatpush3.bf16.msra.mxu0 %v432_v7 }
  0x26   : > { %410 = vmatprep.subr.bf16.mxu0 %v443_v1 }
  0x29   : > { %411 = vmatpush3.bf16.msra.mxu0 %v433_v8 }
  0x2c   : > { %413 = vmatmul.mubr.bf16.vlgmr.msra.gmra.mxu0 %v434_v9 }
  0xec   : > { %v285_v11 = vpop.f32.mrf.mxu0 }
  0xed   : > { %v286_v12 = vadd.f32 %v369_v10, %v285_v11 }
  0xee   : > { %v414_v13 = vpop.f32.mrf.mxu0 }
  0xef   : > { %v292_v14 = vmax.f32 %v286_v12, 0.0 }
  0xf0   : > { %v288_v15 = vpop.f32.mrf.mxu0 }
  0xf1   : > { %v385_v16 = vpack.c.bf16 %v292_v14, %v292_v14  ;;  %v289_v17 = vadd.f32 %v369_v10, %v288_v15 }
  0xf2   : > { %v415_v18 = vpop.f32.mrf.mxu0 }
  0xf3   : > { %303 = vst.msk [vmem:[%s170_s11] sm:$0xf] %vm302_vm1, %v385_v16  ;;  %v293_v19 = vmax.f32 %v289_v17, 0.0 }
  0xf5   : > { %v386_v20 = vpack.c.bf16 %v293_v19, %v293_v19 }
  0xf7   : > { %304 = vst.msk [vmem:[%s170_s11 + $0x4] sm:$0xf] %vm302_vm1, %v386_v20 }
  0xf8 PF: > { %s13_s12 = sadd.s32 1, %s441_s12  }
  0xf9   : > { %p10_p4 = scmp.ge.s32.totalorder %s13_s12, 4  }
  0xfb   :  { %12 = sbr.rel (!%p10_p4) target bundleno = 1 (0x1), region = 62 }

// kernel: conv_stem_forward.7
= control target key start
LH: loop header
LB: loop body
LE: loop exit
PB: predicated region body
PF: predicated region fallthrough
CT: control target
= control target key end

     0   :  { %10 = vsyncpa [#allocation3], 0  ;;  %s1044_s0 = inlined_call_operand.vmem [shape: bf16[2,6,128], index: 0, kind: input, shape index: {}]   ;;  %s1045_s1 = inlined_call_operand.vmem [shape: bf16[2,128,32], index: 1, kind: input, shape index: {}]   ;;  %s1046_s2 = inlined_call_operand.vmem [shape: f32[1,32], index: 2, kind: input, shape index: {}]   ;;  %s1047_s3 = inlined_call_operand.vmem [shape: bf16[32,32], index: 3, kind: input, shape index: {}]   ;;  %s1048_s4 = inlined_call_operand.vmem [shape: f32[1,32], index: 4, kind: input, shape index: {}]   ;;  %s1049_s5 = inlined_call_operand.hbm [shape: f32[2,4,32], index: 5, kind: output, shape index: {}]  }
   0x1   :  { %12 = vsyncpa [#allocation3 + $0x1], 0  ;;  %s861_s18 = smov 0   ;;  %s863_s19 = smov 0  }
   0x2   :  { %s865_s20 = smov 0   ;;  %s867_s21 = smov 0  }
   0x3 LB: > { %s882_s22 = sadd.s32 4294967295, %s826_s21   ;;  %s589_s23 = sadd.s32 4294967294, %s826_s21   ;;  %s826_s21 = sphi %s867_s21, %s1055_s21   ;;  %s822_s20 = sphi %s865_s20, %s1054_s20   ;;  %s818_s19 = sphi %s863_s19, %s1053_s19   ;;  %s814_s18 = sphi %s861_s18, %s1052_s18  }
   0x4   : > { %s886_s24 = sadd.s32 1, %s826_s21   ;;  %s135_s25 = sadd.s32 1, %s822_s20 }
   0x5   : > { %s132_s26 = ssub.s32 %s826_s21, %s886_s24  ;;  %p145_p0 = scmp.ne.s32.totalorder %s822_s20, %s818_s19 }
   0x6   : > { %p133_p1 = scmp.eq.s32.totalorder %s132_s26, 0  ;;  %p146_p2 = scmp.eq.s32.totalorder %s882_s22, 1 }
   0x7   : > { %p151_p3 = scmp.ne.s32.totalorder %s818_s19, %s814_s18  ;;  %p152_p4 = scmp.eq.s32.totalorder %s589_s23, 1 }
   0x8   : > { %s897_s27 = scalar_select %p133_p1, %s822_s20, %s135_s25  }
   0x9   : > { %p899_p5 = por %p146_p2, %p145_p0  ;;  %p903_p6 = por %p152_p4, %p151_p3 }
   0xa   : > { %p592_p7 = scmp.ge.s32.totalorder %s826_s21, 1  ;;  %p189_p8 = scmp.lt.s32.totalorder %s826_s21, 3 }
   0xc   : > { %p190_p9 = pnand %p592_p7, %p189_p8 }
   0xd   : > { %p216_p10 = scmp.lt.s32.totalorder (!%p190_p9), %s882_s22, 1  ;;  %s213_s16 = sand.u32 (!%p190_p9), 1, %s818_s19  }
   0xe   : > { %193 = sbr.rel (%p190_p9) target bundleno = 463 (0x1cf), region = 40  ;;  %s634_s26 = sshll.u32 (!%p190_p9), %s882_s22, 6 }
   0xf   : > { %s1003_s9 = scalar_lea.hbm (!%p190_p9), %s1049_s5, %s634_s26  ;;  %s517_s10 = scalar_lea.sflag (!%p190_p9), [#allocation3], %s213_s16 }
  0x10   : > { %s830_s11 = smov (!%p190_p9), [#allocation2]  }
  0x11   : > { %s770_s12 = sshll.u32 (!%p190_p9), %s830_s11, 4  ;;  %s771_s12 = int_to_ptr.vmem [resolvable:$false] %s770_s12 }
  0x12   : > { %s772_s14 = scalar_lea.vmem (!%p190_p9), %s771_s12, 128 }
  0x13   : > { %v747_v0 = vld [vmem:[%s1045_s1 + $0x78] sm:$0xff]   ;;  %v828_v1 = vmov 0.0   ;;  %v749_v3 = vld [vmem:[%s1045_s1 + $0x70] sm:$0xff]   ;;  %vm829_vm0 = vmmov 0   ;;  %v751_v5 = vld [vmem:[%s1045_s1 + $0x68] sm:$0xff]   ;;  %s217_s17 = scalar_select %p216_p10, %s882_s22, 1 }
  0x14   : > { %658 = vmatprep.subr.bf16.mxu0 %v828_v1  ;;  %678 = vmatprep.subr.bf16.mxu1 %v828_v1  ;;  %v748_v2 = vld [vmem:[%s1045_s1 + $0x38] sm:$0xff]   ;;  %v750_v4 = vld [vmem:[%s1045_s1 + $0x30] sm:$0xff]   ;;  %v752_v6 = vld [vmem:[%s1045_s1 + $0x28] sm:$0xff]   ;;  %vm470_vm1 = vcmask 261120   ;;  %vm514_vm2 = vcmask 257024  }
  0x15   : > { %659 = vmatpush3.bf16.msra.mxu0 %v747_v0  ;;  %674 = vmatprep.mubr.msk.bf16.mxu0 %vm829_vm0, %v828_v1  ;;  %v753_v7 = vld [vmem:[%s1045_s1 + $0x60] sm:$0xff]   ;;  %s594_s6 = sshll.u32 %s217_s17, 2  ;;  %v755_v9 = vld [vmem:[%s1045_s1 + $0x58] sm:$0xff]   ;;  %v757_v11 = vld [vmem:[%s1045_s1 + $0x50] sm:$0xff]   ;;  %s593_s17 = sshll.u32 %s213_s16, 2 }
  0x16   : > { %679 = vmatpush3.bf16.msra.mxu1 %v748_v2  ;;  %660 = vmatprep.subr.bf16.mxu0 %v828_v1  ;;  %v754_v8 = vld [vmem:[%s1045_s1 + $0x20] sm:$0xff]   ;;  %v756_v10 = vld [vmem:[%s1045_s1 + $0x18] sm:$0xff]   ;;  %s219_s13 = scalar_lea.vmem %s1044_s0, %s594_s6  ;;  %v758_v12 = vld [vmem:[%s1045_s1 + $0x10] sm:$0xff]   ;;  %s215_s30 = scalar_lea.vmem [#allocation2], %s593_s17 }
  0x17   : > { %680 = vmatprep.subr.bf16.mxu1 %v828_v1  ;;  %694 = vmatprep.mubr.msk.bf16.mxu1 %vm829_vm0, %v828_v1  ;;  %v759_v13 = vld [vmem:[%s1045_s1 + $0x48] sm:$0xff]   ;;  %v763_v15 = vld [vmem:[%s219_s13] ss:$0 sps:$4 sm:$0x66]   ;;  %s530_s6 = sshll.u32 %s215_s30, 4  ;;  %s1005_s6 = int_to_ptr.vmem [resolvable:$true] %s530_s6 }
  0x18   : > { %v760_v14 = vld [vmem:[%s1045_s1 + $0x8] sm:$0xff]   ;;  %v761_v16 = vld [vmem:[%s1045_s1 + $0x40] sm:$0xff]   ;;  %v259_v18 = vrot.slane %v763_v15, 1  ;;  %s766_s22 = scalar_lea.vmem %s1005_s6, 64  ;;  %p773_p0 = scmp.lt.s32.totalorder %s1005_s6, %s771_s12 }
  0x19   : > { %661 = vmatpush3.bf16.msra.mxu0 %v749_v3  ;;  %v762_v17 = vld [vmem:[%s1045_s1] sm:$0xff]   ;;  %v764_v20 = vld [vmem:[%s1047_s3 + $0x8] sm:$0xff]   ;;  %p767_p11 = scmp.ne.s32.totalorder %s1005_s6, %s766_s22  ;;  %p774_p1 = scmp.lt.s32.totalorder %s772_s14, %s766_s22 }
  0x1a   : > { %681 = vmatpush3.bf16.msra.mxu1 %v750_v4  ;;  %662 = vmatprep.subr.bf16.mxu0 %v828_v1  ;;  %v221_v19 = vld [vmem:[%s219_s13] sm:$0x3] }
  0x1b   : > { %682 = vmatprep.subr.bf16.mxu1 %v828_v1  ;;  %v765_v21 = vld [vmem:[%s1047_s3] sm:$0xff]   ;;  %p768_p12 = pnand %p767_p11, %p899_p5  ;;  %p775_p2 = por %p774_p1, %p773_p0 }
  0x1c   : > { %v628_v24 = vld [vmem:[%s1046_s2] ss:$0 sm:$0xff] }
  0x1d   : > { %663 = vmatpush3.bf16.msra.mxu0 %v751_v5  ;;  %v629_v35 = vld [vmem:[%s1048_s4] ss:$0 sm:$0xff]  ;;  %p769_p13 = pneg %p768_p12 }
  0x1e   : > { %683 = vmatpush3.bf16.msra.mxu1 %v752_v6  ;;  %664 = vmatprep.subr.bf16.mxu0 %v828_v1 }
  0x1f   : > { %684 = vmatprep.subr.bf16.mxu1 %v828_v1  ;;  %p776_p3 = pnand %p775_p2, %p769_p13 }
  0x21   : > { %665 = vmatpush3.bf16.msra.mxu0 %v753_v7 }
  0x22   : > { %685 = vmatpush3.bf16.msra.mxu1 %v754_v8  ;;  %666 = vmatprep.subr.bf16.mxu0 %v828_v1 }
  0x23   : > { %686 = vmatprep.subr.bf16.mxu1 %v828_v1 }
  0x25   : > { %667 = vmatpush3.bf16.msra.mxu0 %v755_v9 }
  0x26   : > { %687 = vmatpush3.bf16.msra.mxu1 %v756_v10  ;;  %668 = vmatprep.subr.bf16.mxu0 %v828_v1 }
  0x27   : > { %688 = vmatprep.subr.bf16.mxu1 %v828_v1 }
  0x29   : > { %669 = vmatpush3.bf16.msra.mxu0 %v757_v11 }
  0x2a   : > { %689 = vmatpush3.bf16.msra.mxu1 %v758_v12  ;;  %670 = vmatprep.subr.bf16.mxu0 %v828_v1 }
  0x2b   : > { %690 = vmatprep.subr.bf16.mxu1 %v828_v1 }
  0x2d   : > { %671 = vmatpush3.bf16.msra.mxu0 %v759_v13 }
  0x2e   : > { %691 = vmatpush3.bf16.msra.mxu1 %v760_v14  ;;  %672 = vmatprep.subr.bf16.mxu0 %v828_v1 }
  0x2f   : > { %692 = vmatprep.subr.bf16.mxu1 %v828_v1 }
  0x31   : > { %673 = vmatpush3.bf16.msra.mxu0 %v761_v16 }
  0x32   : > { %693 = vmatpush3.bf16.msra.mxu1 %v762_v17  ;;  %698 = vmatprep.subr.bf16.mxu0 %v828_v1 }
  0x34   : > { %675 = vmatmul.mubr.bf16.vlgmr.msra.gmra.mxu0 %v259_v18 }
  0x35   : > { %695 = vmatmul.mubr.bf16.vlgmr.msra.gmra.mxu1 %v221_v19  ;;  %702 = vmatprep.mubr.msk.bf16.mxu0 %vm829_vm0, %v828_v1 }
  0x36   : > { %699 = vmatpush3.bf16.msra.mxu0 %v764_v20 }
  0x37   : > { %700 = vmatprep.subr.bf16.mxu0 %v828_v1 }
  0x3a   : > { %701 = vmatpush3.bf16.msra.mxu0 %v765_v21 }
  0xf4   : > { %v343_v22 = vpop.f32.mrf.mxu0 }
  0xf5   : > { %v431_v23 = vpop.f32.mrf.mxu1 }
  0xf6   : > { %v432_v25 = vadd.f32 %v431_v23, %v343_v22  ;;  %v676_v26 = vpop.f32.mrf.mxu0 }
  0xf7   : > { %v696_v27 = vpop.f32.mrf.mxu1 }
  0xf8   : > { %v444_v28 = vadd.f32 %v628_v24, %v432_v25  ;;  %v346_v29 = vpop.f32.mrf.mxu0 }
  0xf9   : > { %v434_v30 = vpop.f32.mrf.mxu1 }
  0xfa   : > { %v445_v31 = vmax.f32 %v444_v28, 0.0  ;;  %v677_v32 = vpop.f32.mrf.mxu0 }
  0xfb   : > { %v697_v33 = vpop.f32.mrf.mxu1 }
  0xfc   : > { %v446_v34 = vpack.c.bf16 %v445_v31, %v445_v31 }
  0xfe   : > { %703 = vmatmul.mubr.msk.bf16.vlgmr.msra.gmra.mxu0 %vm470_vm1, %v446_v34 }
 0x1be   : > { %v508_v36 = vpop.f32.mrf.mxu0 }
 0x1bf   : > { %v509_v37 = vadd.f32 %v629_v35, %v508_v36 }
 0x1c0   : > { %v704_v38 = vpop.f32.mrf.mxu0 }
 0x1c1   : > { %515 = vst.msk [vmem:[%s215_s30] sm:$0xf] %vm514_vm2, %v509_v37 }
 0x1c2   : > { %v511_v39 = vpop.f32.mrf.mxu0 }
 0x1c3   : > { %779 = shalt.err (!%p776_p3)
}
 0x1c4   : > { %s780_s13 = scalar_lea.hbm %s1003_s9, 64  ;;  %s784_s17 = scalar_lea.hbm %s1049_s5, 128 }
 0x1c5   : > { %p781_p4 = scmp.ne.s32.totalorder %s1003_s9, %s780_s13  ;;  %p785_p9 = scmp.lt.s32.totalorder %s1003_s9, %s1049_s5 }
 0x1c6   : > { %p786_p10 = scmp.lt.s32.totalorder %s784_s17, %s780_s13 }
 0x1c7   : > { %p782_p7 = pnand %p781_p4, %p899_p5 }
 0x1c8   : > { %p787_p11 = por %p786_p10, %p785_p9 }
 0x1c9   : > { %p783_p8 = pneg %p782_p7 }
 0x1cb   : > { %p788_p12 = pnand %p787_p11, %p783_p8 }
 0x1cd   : > { %791 = shalt.err (!%p788_p12)
}
 0x1ce   : > { %706 = dma.vmem_to_hbm [thread:$0]  (%p899_p5), %s1005_s6, 64, %s1003_s9, %s517_s10   ;;  %v705_v40 = vpop.f32.mrf.mxu0 }
 0x1cf PF: > { %p712_p13 = scmp.ge.s32.totalorder %s826_s21, 2  ;;  %s542_s26 = sand.u32 1, %s814_s18  }
 0x1d0   : > { %s543_s30 = scalar_lea.sflag [#allocation3], %s542_s26 }
 0x1d1   : > { %p709_p0 = pnand %p712_p13, %p903_p6 }
 0x1d3   : > { %p710_p1 = pneg %p709_p0 }
 0x1d5   : > { %809 = dma.done.wait (%p710_p1), %s543_s30, 64  }
 0x1d6   : > { %811 = vsyncadd (%p710_p1), %s543_s30, 4294967232  ;;  %p15_p2 = scmp.ge.s32.totalorder %s886_s24, 4   ;;  %s1052_s18 = smov %s818_s19 }
 0x1d7   : > { %s1053_s19 = smov %s822_s20  ;;  %s1054_s20 = smov %s897_s27 }
 0x1d8   : > { %s1055_s21 = smov %s886_s24  ;;  %17 = sbr.rel (!%p15_p2) target bundleno = 3 (0x3), region = 76 }
 0x1dd   :  { %548 = vsyncpa [#allocation3], 1 }
 0x1de   :  { %550 = vsyncpa [#allocation3 + $0x1], 1 }

</bundles_post_ra>
